<compile_context>
chip_gen: v7x
topology: tpu7x:2x2x1
jax: 0.10.0
libtpu: 0.0.40
codegen_flags: <defaults>
</compile_context>

<pallas_src>
import functools
import math

import jax
import jax.numpy as jnp
from jax.experimental import pallas as pl
from jax.experimental.pallas import tpu as pltpu


_LANE = 128
_SUBLANE = 8
# Target for the double-buffered VMEM working set (x, W, bias, out tiles).
_VMEM_BUDGET = 20 * 1024 * 1024


def _round_up(x, m):
    return ((x + m - 1) // m) * m


def _cdiv(a, b):
    return (a + b - 1) // b


def _pick_tm(B, cap=256):
    """Row tile: full batch if small; otherwise an exact divisor of B that is
    a multiple of 8 in [128, cap], so no MXU work / DMA is wasted on a ragged
    last M tile (e.g. B=384 -> 192, B=1000 -> 200)."""
    if B <= cap:
        return B if B % _SUBLANE == 0 else _round_up(B, _SUBLANE)
    for t in range(cap, _LANE - 1, -_SUBLANE):
        if B % t == 0:
            return t
    return cap


def _select_tiles(B, K, N, itemsize=4):
    tm = _pick_tm(B)
    Np128 = _round_up(N, _LANE)

    def max_tn(tk):
        # double-buffered x, W, bias, out tiles:
        #   2*itemsize*(tm*tk + tk*tn + tn + tm*tn) <= budget
        avail = _VMEM_BUDGET - 2 * itemsize * tm * tk
        denom = 2 * itemsize * (tk + 1 + tm)
        return max(avail // denom, 0)

    tk = K  # keep the whole reduction resident -> no K grid axis
    if max_tn(tk) < 2 * _LANE and K > 1024:
        tk = 4 * _LANE  # huge-K fallback: split the reduction
    tn = min(Np128, 8 * _LANE, (max_tn(tk) // _LANE) * _LANE)
    tn = max(tn, _LANE)

    # v7x has 2 TensorCores: guarantee >= 2 tiles on a "parallel" axis when the
    # (M, N) grid would otherwise be a single tile (harmless on v5e/v6e).
    if _cdiv(B, tm) == 1 and _cdiv(N, tn) == 1 and Np128 >= 2 * _LANE:
        tn = _round_up(_cdiv(Np128, 2), _LANE)
    return tm, tk, tn


def _linear_kernel(x_ref, w_ref, b_ref, o_ref, *, precision):
    # Fast path: whole reduction resident -> one MXU dot + bias per tile.
    o_ref[...] = (
        jnp.dot(x_ref[...], w_ref[...],
                preferred_element_type=jnp.float32, precision=precision)
        + b_ref[...]
    ).astype(o_ref.dtype)


def _linear_ksplit_kernel(x_ref, w_ref, b_ref, o_ref, *, precision):
    # K is the innermost ("arbitrary") grid axis.  The output tile's index_map
    # is (i, j), so it stays resident in VMEM across K and doubles as the f32
    # accumulator (no separate scratch buffer).
    k = pl.program_id(2)

    @pl.when(k == 0)
    def _init():
        o_ref[...] = jnp.zeros_like(o_ref)

    o_ref[...] += jnp.dot(x_ref[...], w_ref[...],
                          preferred_element_type=jnp.float32,
                          precision=precision).astype(o_ref.dtype)

    @pl.when(k == pl.num_programs(2) - 1)
    def _finalize():
        # Bias added exactly once, on the final K step.
        o_ref[...] += b_ref[...].astype(o_ref.dtype)


def unified_representation_space_forward(
    knowledge_features, w_k, b_k, *,
    precision=jax.lax.Precision.HIGHEST, tiles=None,
):
    """y = knowledge_features @ w_k + b_k via a tiled Pallas TPU kernel.

    knowledge_features: (B, knowledge_dim) float32
    w_k:                (knowledge_dim, output_dim) float32  (= PyTorch weight.T)
    b_k:                (output_dim,) float32
    """
    x = knowledge_features
    B, K = x.shape
    K2, N = w_k.shape
    assert K == K2
    assert b_k.shape == (N,)
    out_dtype = x.dtype

    if tiles is not None:
        tm, tk, tn = tiles
    else:
        tm, tk, tn = _select_tiles(B, K, N)

    b2 = b_k.reshape(1, N)
    grid_m = _cdiv(B, tm)
    grid_n = _cdiv(N, tn)

    cost = pl.CostEstimate(
        flops=2 * B * K * N,
        transcendentals=0,
        bytes_accessed=4 * (B * K + K * N + B * N + N),
    )
    # VMEM limit from the actual double-buffered tile working set (+ slack);
    # stays well inside v7x's 64 MiB physical VMEM.
    work = 2 * 4 * (tm * tk + tk * tn + tn + tm * tn)
    vmem_limit = int(min(max(work + (8 << 20), 16 << 20), 48 << 20))

    if tk == K:
        # ---- Fast path: no reduction grid axis, grid over (M, N) only. ----
        return pl.pallas_call(
            functools.partial(_linear_kernel, precision=precision),
            out_shape=jax.ShapeDtypeStruct((B, N), out_dtype),
            grid=(grid_m, grid_n),
            in_specs=[
                pl.BlockSpec((tm, K), lambda i, j: (i, 0)),   # x tile (full K)
                pl.BlockSpec((K, tn), lambda i, j: (0, j)),   # W column block
                pl.BlockSpec((1, tn), lambda i, j: (0, j)),   # bias block
            ],
            out_specs=pl.BlockSpec((tm, tn), lambda i, j: (i, j)),
            compiler_params=pltpu.CompilerParams(
                dimension_semantics=("parallel", "parallel"),
                vmem_limit_bytes=vmem_limit,
            ),
            cost_estimate=cost,
        )(x, w_k, b2)

    # ---- Huge-K fallback: split the reduction. Only K is zero-padded
    # (required: a ragged/garbage K tail would corrupt valid outputs). ----
    assert out_dtype == jnp.float32, (
        "K-split path accumulates directly into the f32 output tile")
    # TODO(synk): add an f32 scratch-accumulator variant for non-f32 outputs.
    Kp = _round_up(K, tk)
    x_p = jnp.pad(x, ((0, 0), (0, Kp - K))) if Kp != K else x
    w_p = jnp.pad(w_k, ((0, Kp - K), (0, 0))) if Kp != K else w_k

    return pl.pallas_call(
        functools.partial(_linear_ksplit_kernel, precision=precision),
        out_shape=jax.ShapeDtypeStruct((B, N), out_dtype),
        grid=(grid_m, grid_n, Kp // tk),
        in_specs=[
            pl.BlockSpec((tm, tk), lambda i, j, k: (i, k)),
            pl.BlockSpec((tk, tn), lambda i, j, k: (k, j)),
            pl.BlockSpec((1, tn), lambda i, j, k: (0, j)),
        ],
        out_specs=pl.BlockSpec((tm, tn), lambda i, j, k: (i, j)),
        compiler_params=pltpu.CompilerParams(
            dimension_semantics=("parallel", "parallel", "arbitrary"),
            vmem_limit_bytes=vmem_limit,
        ),
        cost_estimate=cost,
    )(x_p, w_p, b2)


def init_params(key, text_dim, knowledge_dim, output_dim):
    """Deterministic init matching nn.Linear's U(-1/sqrt(in), 1/sqrt(in))."""
    k_txt_w, k_txt_b, k_kn_w, k_kn_b = jax.random.split(key, 4)

    # text_projector (unused in forward, kept for module fidelity)
    bt = 1.0 / math.sqrt(text_dim)
    text_w = jax.random.uniform(k_txt_w, (text_dim, output_dim),
                                minval=-bt, maxval=bt, dtype=jnp.float32)
    text_b = jax.random.uniform(k_txt_b, (output_dim,),
                                minval=-bt, maxval=bt, dtype=jnp.float32)

    # knowledge_projector (the one actually used in forward)
    bk = 1.0 / math.sqrt(knowledge_dim)
    kn_w = jax.random.uniform(k_kn_w, (knowledge_dim, output_dim),
                              minval=-bk, maxval=bk, dtype=jnp.float32)
    kn_b = jax.random.uniform(k_kn_b, (output_dim,),
                              minval=-bk, maxval=bk, dtype=jnp.float32)

    # LayerNorm params (unused in forward)
    ln_gamma = jnp.ones((output_dim,), jnp.float32)
    ln_beta = jnp.zeros((output_dim,), jnp.float32)

    return dict(text_w=text_w, text_b=text_b,
                kn_w=kn_w, kn_b=kn_b,
                ln_gamma=ln_gamma, ln_beta=ln_beta)


if __name__ == "__main__":
    HI = jax.lax.Precision.HIGHEST

    # Small shapes consistent with the module.
    batch, text_dim, knowledge_dim, output_dim = 8, 32, 32, 64
    key = jax.random.PRNGKey(0)
    k_params, k_x = jax.random.split(key)
    params = init_params(k_params, text_dim, knowledge_dim, output_dim)
    knowledge_features = jax.random.normal(
        k_x, (batch, knowledge_dim), dtype=jnp.float32)

    out = unified_representation_space_forward(
        knowledge_features, params["kn_w"], params["kn_b"])
    out = jax.block_until_ready(out)
    ref = jnp.dot(knowledge_features, params["kn_w"], precision=HI) + params["kn_b"]
    assert out.shape == (batch, output_dim)
    assert jnp.allclose(out, ref, atol=1e-5, rtol=1e-5), (
        float(jnp.max(jnp.abs(out - ref))))

    # Larger multi-tile shape exercising the (M, N) grid (fast path, no pad).
    B2, K2d, N2 = 384, 640, 768
    kx2, kw2, kb2 = jax.random.split(jax.random.PRNGKey(1), 3)
    x2 = jax.random.normal(kx2, (B2, K2d), dtype=jnp.float32)
    w2 = jax.random.normal(kw2, (K2d, N2), dtype=jnp.float32) * 0.02
    b2 = jax.random.normal(kb2, (N2,), dtype=jnp.float32)
    out2 = jax.block_until_ready(
        unified_representation_space_forward(x2, w2, b2))
    ref2 = jnp.dot(x2, w2, precision=HI) + b2
    assert jnp.allclose(out2, ref2, atol=1e-4, rtol=1e-4), (
        float(jnp.max(jnp.abs(out2 - ref2))))

    # Force the K-split (accumulate-into-output) path with explicit tiles.
    B3, K3, N3 = 16, 384, 256
    kx3, kw3, kb3 = jax.random.split(jax.random.PRNGKey(2), 3)
    x3 = jax.random.normal(kx3, (B3, K3), dtype=jnp.float32)
    w3 = jax.random.normal(kw3, (K3, N3), dtype=jnp.float32) * 0.05
    b3 = jax.random.normal(kb3, (N3,), dtype=jnp.float32)
    out3 = jax.block_until_ready(
        unified_representation_space_forward(x3, w3, b3, tiles=(16, 128, 128)))
    ref3 = jnp.dot(x3, w3, precision=HI) + b3
    assert jnp.allclose(out3, ref3, atol=1e-4, rtol=1e-4), (
        float(jnp.max(jnp.abs(out3 - ref3))))

    print("KERNEL_OK")
</pallas_src>

<mosaic_0001>
module attributes {stable_mosaic.version = 11 : i64} {
  func.func @_linear_kernel(%arg0: i32, %arg1: i32, %arg2: memref<8x32xf32, #tpu.memory_space<vmem>>, %arg3: memref<32x128xf32, #tpu.memory_space<vmem>>, %arg4: memref<1x128xf32, #tpu.memory_space<vmem>>, %arg5: memref<8x128xf32, #tpu.memory_space<vmem>>) attributes {dimension_semantics = [#tpu.dimension_semantics<parallel>, #tpu.dimension_semantics<parallel>], iteration_bounds = array<i64: 1, 1>, scalar_prefetch = 0 : i64, scratch_operands = 0 : i64, tpu.core_type = #tpu.core_type<tc>, window_params = [{transform_indices = @transform_0, window_bounds = array<i64: 8, 32>}, {transform_indices = @transform_1, window_bounds = array<i64: 32, 128>}, {transform_indices = @transform_2, window_bounds = array<i64: 1, 128>}, {transform_indices = @transform_3, window_bounds = array<i64: 8, 128>}]} {
    %c0 = arith.constant 0 : index
    %c0_0 = arith.constant 0 : index
    %0 = vector.load %arg2[%c0, %c0_0] : memref<8x32xf32, #tpu.memory_space<vmem>>, vector<8x32xf32>
    %c0_1 = arith.constant 0 : index
    %c0_2 = arith.constant 0 : index
    %1 = vector.load %arg3[%c0_1, %c0_2] : memref<32x128xf32, #tpu.memory_space<vmem>>, vector<32x128xf32>
    %cst = arith.constant dense<0.000000e+00> : vector<8x128xf32>
    %2 = tpu.matmul %0, %1, %cst {dimension_numbers = #tpu.dot_dimension_numbers<[1], [0], [0], [1], [0, 0, 1, 1], [], []>, precision = #tpu.contract_precision<fp32>} : vector<8x32xf32>, vector<32x128xf32>, vector<8x128xf32> -> vector<8x128xf32>
    %c0_3 = arith.constant 0 : index
    %c0_4 = arith.constant 0 : index
    %3 = vector.load %arg4[%c0_3, %c0_4] : memref<1x128xf32, #tpu.memory_space<vmem>>, vector<1x128xf32>
    %4 = vector.broadcast %3 : vector<1x128xf32> to vector<8x128xf32>
    %5 = arith.addf %2, %4 : vector<8x128xf32>
    %c0_5 = arith.constant 0 : index
    %c0_6 = arith.constant 0 : index
    %6 = vector.load %arg5[%c0_5, %c0_6] : memref<8x128xf32, #tpu.memory_space<vmem>>, vector<8x128xf32>
    tpu.vector_store %arg5[%c0_5, %c0_6], %5 {strides = array<i32>} : memref<8x128xf32, #tpu.memory_space<vmem>>, vector<8x128xf32>,
    return
  }
  func.func @transform_0(%arg0: i32, %arg1: i32) -> (i32, i32) {
    %c0_i32 = arith.constant 0 : i32
    %c0_i32_0 = arith.constant 0 : i32
    return %arg0, %c0_i32 : i32, i32
  }
  func.func @transform_1(%arg0: i32, %arg1: i32) -> (i32, i32) {
    %c0_i32 = arith.constant 0 : i32
    %c0_i32_0 = arith.constant 0 : i32
    return %c0_i32, %arg1 : i32, i32
  }
  func.func @transform_2(%arg0: i32, %arg1: i32) -> (i32, i32) {
    %c0_i32 = arith.constant 0 : i32
    %c0_i32_0 = arith.constant 0 : i32
    return %c0_i32, %arg1 : i32, i32
  }
  func.func @transform_3(%arg0: i32, %arg1: i32) -> (i32, i32) {
    %c0_i32 = arith.constant 0 : i32
    return %arg0, %arg1 : i32, i32
  }
}

</mosaic_0001>

<bundles_post_ra>
// kernel: tpu_custom_call.1
= control target key start
LH: loop header
LB: loop body
LE: loop exit
PB: predicated region body
PF: predicated region fallthrough
CT: control target
= control target key end

     0   :  { %8 = vsyncpa [#allocation3], 0  ;;  %s880_s0 = inlined_call_operand.hbm [shape: f32[8,32], index: 0, kind: input, shape index: {}]   ;;  %s881_s1 = inlined_call_operand.hbm [shape: f32[32,64], index: 1, kind: input, shape index: {}]   ;;  %s882_s2 = inlined_call_operand.vmem [shape: f32[1,64], index: 2, kind: input, shape index: {}]   ;;  %s883_s3 = inlined_call_operand.hbm [shape: f32[8,64], index: 3, kind: output, shape index: {}]  }
   0x1   :  { %9 = vsyncpa [#allocation6], 0 }
   0x2   :  { %10 = vsyncpa [#allocation4], 0  ;;  %s782_s12 = smov [#allocation2]   ;;  %s783_s14 = smov [#allocation5]  }
   0x3   :  { %s17_s13 = sshll.u32 %s782_s12, 4  ;;  %s26_s15 = sshll.u32 %s783_s14, 4  ;;  %s18_s13 = int_to_ptr.vmem [resolvable:$true] %s17_s13  ;;  %s810_s15 = int_to_ptr.vmem [resolvable:$true] %s26_s15 }
   0x4   :  { %s710_s18 = scalar_lea.hbm %s880_s0, 128 }
   0x5   :  { %p711_p0 = scmp.ne.s32.totalorder %s880_s0, %s710_s18  ;;  %p714_p1 = scmp.lt.u32.totalorder %s710_s18, %s880_s0 }
   0x7   :  { %p716_p2 = pnand %p714_p1, %p711_p0 }
   0x9   :  { %719 = shalt.err (!%p716_p2)
}
   0xa   :  { %s720_s23 = scalar_lea.vmem %s18_s13, 128  ;;  %p725_p4 = scmp.lt.s32.totalorder %s18_s13, %s18_s13 }
   0xb   :  { %p721_p3 = scmp.ne.s32.totalorder %s18_s13, %s720_s23  ;;  %p726_p5 = scmp.lt.s32.totalorder %s720_s23, %s720_s23 }
   0xd   :  { %p727_p6 = por %p726_p5, %p725_p4 }
   0xf   :  { %p728_p7 = pnand %p727_p6, %p721_p3 }
  0x11   :  { %731 = shalt.err (!%p728_p7)
}
  0x12   :  { %20 = dma.hbm_to_vmem [thread:$0]  %s880_s0, 128, %s18_s13, [#allocation3]  }
  0x13   :  { %s732_s28 = scalar_lea.hbm %s881_s1, 512 }
  0x14   :  { %p733_p8 = scmp.ne.s32.totalorder %s881_s1, %s732_s28  ;;  %p736_p9 = scmp.lt.u32.totalorder %s732_s28, %s881_s1 }
  0x16   :  { %p738_p10 = pnand %p736_p9, %p733_p8 }
  0x18   :  { %741 = shalt.err (!%p738_p10)
}
  0x19   :  { %s742_s6 = scalar_lea.vmem %s810_s15, 512  ;;  %p747_p12 = scmp.lt.s32.totalorder %s810_s15, %s810_s15 }
  0x1a   :  { %p743_p11 = scmp.ne.s32.totalorder %s810_s15, %s742_s6  ;;  %p748_p13 = scmp.lt.s32.totalorder %s742_s6, %s742_s6 }
  0x1c   :  { %p749_p0 = por %p748_p13, %p747_p12 }
  0x1e   :  { %p750_p1 = pnand %p749_p0, %p743_p11 }
  0x20   :  { %753 = shalt.err (!%p750_p1)
}
  0x21   :  { %s784_s0 = smov 128   ;;  %s785_s7 = smov 8  }
  0x22   :  { %32 = dma.hbm_to_vmem [thread:$0]  %s881_s1, 512, %s810_s15, [#allocation6], %s784_s0, %s784_s0, %s785_s7  }
  0x23   :  { %776 = dma.done.wait [#allocation3], 128  }
  0x24   :  { %777 = vsyncadd [#allocation3], 4294967168 }
  0x25   :  { %778 = dma.done.wait [#allocation6], 512  }
  0x26   :  { %779 = vsyncadd [#allocation6], 4294966784  ;;  %v786_v0 = vmov 0.0|0.0   ;;  %vm787_vm0 = vmmov 0   ;;  %v788_v1 = vmov 0.0   ;;  %vm53_vm1 = vcmask 261120  }
  0x27   :  { %656 = vmatprep.subr.bf16.mxu1 %v786_v0  ;;  %674 = vmatprep.subr.bf16.mxu0 %v786_v0  ;;  %v42_v2 = vld [vmem:[#allocation5] sm:$0xff]  ;;  %v43_v3 = vld [vmem:[#allocation5 + $0x8] sm:$0xff]  ;;  %v44_v4 = vld [vmem:[#allocation5 + $0x10] sm:$0xff]  ;;  %s789_s11 = smov [#allocation7]  }
  0x28   :  { %598 = vmatprep.mubr.msk.f32.mxu1 %vm787_vm0, %v788_v1  ;;  %631 = vmatprep.mubr.msk.f32.mxu0 %vm787_vm0, %v788_v1  ;;  %v58_v5 = vand.u32 4294901760, %v42_v2  ;;  %v61_v6 = vand.u32 4294901760, %v43_v3  ;;  %v45_v7 = vld [vmem:[#allocation5 + $0x18] sm:$0xff]  ;;  %v64_v8 = vand.u32 4294901760, %v44_v4  ;;  %s549_s12 = sshll.u32 %s789_s11, 4  ;;  %s550_s12 = int_to_ptr.vmem [resolvable:$true] %s549_s12 }
  0x29   :  { %v41_v9 = vld [vmem:[#allocation2] sm:$0xff]  ;;  %v67_v10 = vand.u32 4294901760, %v45_v7  ;;  %s754_s13 = scalar_lea.vmem %s550_s12, 128  ;;  %p759_p3 = scmp.lt.s32.totalorder %s550_s12, %s550_s12 }
  0x2a   :  { %v55_v11 = vsel %vm53_vm1, %v41_v9, 0  ;;  %v657_v12 = vpack.c.bf16 %v61_v6, %v58_v5  ;;  %v138_v13 = vsub.f32 %v42_v2, %v58_v5  ;;  %v145_v14 = vsub.f32 %v43_v3, %v61_v6  ;;  %v559_v41 = vld [vmem:[%s882_s2] ss:$0 sm:$0xff]  ;;  %p755_p2 = scmp.ne.s32.totalorder %s550_s12, %s754_s13  ;;  %p760_p4 = scmp.lt.s32.totalorder %s754_s13, %s754_s13 }
  0x2b   :  { %v152_v15 = vsub.f32 %v44_v4, %v64_v8  ;;  %v159_v16 = vsub.f32 %v45_v7, %v67_v10  ;;  %v126_v17 = vand.u32 4294901760, %v55_v11  ;;  %v660_v18 = vpack.c.bf16 %v67_v10, %v64_v8 }
  0x2c   :  { %658 = vmatpush3.bf16.msra.mxu1 %v657_v12  ;;  %676 = vmatpush3.bf16.msra.mxu0 %v657_v12  ;;  %v139_v19 = vand.u32 4294901760, %v138_v13  ;;  %v146_v20 = vand.u32 4294901760, %v145_v14  ;;  %v669_v39 = vpack.c.bf16 %v145_v14, %v138_v13  ;;  %p761_p5 = por %p760_p4, %p759_p3 }
  0x2d   :  { %v153_v21 = vand.u32 4294901760, %v152_v15  ;;  %659 = vmatprep.subr.bf16.mxu1 %v786_v0  ;;  %677 = vmatprep.subr.bf16.mxu0 %v786_v0  ;;  %v127_v22 = vsub.f32 %v55_v11, %v126_v17  ;;  %v160_v23 = vand.u32 4294901760, %v159_v16  ;;  %v672_v40 = vpack.c.bf16 %v159_v16, %v152_v15 }
  0x2e   :  { %v140_v24 = vsub.f32 %v138_v13, %v139_v19  ;;  %v147_v25 = vsub.f32 %v145_v14, %v146_v20  ;;  %v681_v31 = vpack.c.bf16 %v146_v20, %v139_v19  ;;  %p762_p6 = pnand %p761_p5, %p755_p2 }
  0x2f   :  { %v154_v26 = vsub.f32 %v152_v15, %v153_v21  ;;  %v128_v27 = vand.u32 4294901760, %v127_v22  ;;  %v161_v28 = vsub.f32 %v159_v16, %v160_v23  ;;  %v684_v37 = vpack.c.bf16 %v160_v23, %v153_v21 }
  0x30   :  { %661 = vmatpush3.bf16.msra.mxu1 %v660_v18  ;;  %679 = vmatpush3.bf16.msra.mxu0 %v660_v18  ;;  %v141_v29 = vand.u32 4294901760, %v140_v24  ;;  %v148_v30 = vand.u32 4294901760, %v147_v25 }
  0x31   :  { %v129_v32 = vsub.f32 %v127_v22, %v128_v27  ;;  %662 = vmatprep.subr.bf16.mxu1 %v786_v0  ;;  %680 = vmatprep.subr.bf16.mxu0 %v786_v0  ;;  %v155_v34 = vand.u32 4294901760, %v154_v26  ;;  %v162_v35 = vand.u32 4294901760, %v161_v28 }
  0x32   :  { %v663_v33 = vpack.c.bf16 %v148_v30, %v141_v29 }
  0x33   :  { %v130_v36 = vand.u32 4294901760, %v129_v32  ;;  %632 = vmatmul.mubr.f32.vlgmr.msra.gmra.mrb[0].mxu0 %v128_v27  ;;  %v666_v38 = vpack.c.bf16 %v162_v35, %v155_v34 }
  0x34   :  { %682 = vmatpush3.bf16.msra.mxu0 %v681_v31  ;;  %642 = vmatprep.mubr.msk.f32.mxu0 %vm787_vm0, %v788_v1 }
  0x35   :  { %599 = vmatmul.mubr.f32.vlgmr.msra.gmra.mrb[0].mxu1 %v130_v36  ;;  %683 = vmatprep.subr.bf16.mxu0 %v786_v0 }
  0x36   :  { %664 = vmatpush3.bf16.msra.mxu1 %v663_v33  ;;  %609 = vmatprep.mubr.msk.f32.mxu1 %vm787_vm0, %v788_v1 }
  0x37   :  { %665 = vmatprep.subr.bf16.mxu1 %v786_v0 }
  0x38   :  { %685 = vmatpush3.bf16.msra.mxu0 %v684_v37 }
  0x39   :  { %686 = vmatprep.subr.bf16.mxu0 %v786_v0 }
  0x3a   :  { %667 = vmatpush3.bf16.msra.mxu1 %v666_v38 }
  0x3b   :  { %668 = vmatprep.subr.bf16.mxu1 %v786_v0  ;;  %643 = vmatmul.mubr.f32.vlgmr.msra.gmra.mrb[0].mxu0 %v126_v17 }
  0x3c   :  { %688 = vmatpush3.bf16.msra.mxu0 %v657_v12  ;;  %653 = vmatprep.mubr.msk.f32.mxu0 %vm787_vm0, %v788_v1 }
  0x3d   :  { %610 = vmatmul.mubr.f32.vlgmr.msra.gmra.mrb[0].mxu1 %v126_v17  ;;  %689 = vmatprep.subr.bf16.mxu0 %v786_v0 }
  0x3e   :  { %670 = vmatpush3.bf16.msra.mxu1 %v669_v39  ;;  %620 = vmatprep.mubr.msk.f32.mxu1 %vm787_vm0, %v788_v1 }
  0x3f   :  { %671 = vmatprep.subr.bf16.mxu1 %v786_v0 }
  0x40   :  { %691 = vmatpush3.bf16.msra.mxu0 %v660_v18 }
  0x42   :  { %673 = vmatpush3.bf16.msra.mxu1 %v672_v40 }
  0x43   :  { %654 = vmatmul.mubr.f32.vlgmr.msra.gmra.mrb[0].mxu0 %v126_v17 }
  0x45   :  { %621 = vmatmul.mubr.f32.vlgmr.msra.gmra.mrb[0].mxu1 %v127_v22 }
 0x116   :  { %v538_v42 = vpop.f32.mrb[0].mxu0 }
 0x117   :  { %v655_v43 = vpop.f32.mrb[1].mxu0 }
 0x118   :  { %v303_v44 = vpop.f32.mrb[0].mxu1 }
 0x119   :  { %v692_v45 = vadd.f32 %v559_v41, %v303_v44  ;;  %v622_v46 = vpop.f32.mrb[1].mxu1 }
 0x11b   :  { %v693_v47 = vadd.f32 %v692_v45, %v538_v42 }
 0x11d   :  { %542 = vst [vmem:[#allocation7] sm:$0xff] %v693_v47 }
 0x11e   :  { %765 = shalt.err (!%p762_p6)
}
 0x11f   :  { %s766_s2 = scalar_lea.hbm %s883_s3, 128 }
 0x120   :  { %p767_p7 = scmp.ne.s32.totalorder %s883_s3, %s766_s2  ;;  %p770_p8 = scmp.lt.u32.totalorder %s766_s2, %s883_s3 }
 0x122   :  { %p772_p9 = pnand %p770_p8, %p767_p7 }
 0x124   :  { %775 = shalt.err (!%p772_p9)
}
 0x125   :  { %552 = dma.vmem_to_hbm [thread:$0]  %s550_s12, 128, %s883_s3, [#allocation4]  }
 0x126   :  { %780 = dma.done.wait [#allocation4], 128  }
 0x127   :  { %781 = vsyncadd [#allocation4], 4294967168 }
 0x128   :  { %556 = vsyncpa [#allocation3], 1 }
 0x129   :  { %557 = vsyncpa [#allocation6], 1 }
 0x12a   :  { %558 = vsyncpa [#allocation4], 1 }

</bundles_post_ra>
